<compile_context>
chip_gen: v6e
topology: v6e:2x2x1
jax: 0.10.0
libtpu: 0.0.40
codegen_flags: <defaults>
</compile_context>

<pallas_src>
import functools

import jax
import jax.numpy as jnp
from jax.experimental import pallas as pl
from jax.experimental.pallas import tpu as pltpu

MSE_WEIGHT = 0.7   # weight on latent-space MSE
MEL_WEIGHT = 0.3   # weight on decoded-mel MSE


def _mel_loss_kernel(x_ref, t_ref, wwt_ref, out_ref, g_acc, lat_acc, *, bt, lat_scale):
    # x_ref / t_ref : (Bt, C, HW_TILE) VMEM, lane-dense (H*W on lanes)
    # wwt_ref       : (C, C)           VMEM, MEL_WEIGHT/(C_mel*HW) * (W @ W^T)
    # out_ref       : (B,)             SMEM, per-instance loss
    # g_acc         : (Bt, C, C)       VMEM scratch (Gram accumulator)
    # lat_acc       : (Bt, C)          VMEM scratch (sum of d^2 per row/channel)
    bb = pl.program_id(0)
    k = pl.program_id(1)

    @pl.when(k == 0)
    def _():
        g_acc[...] = jnp.zeros_like(g_acc)
        lat_acc[...] = jnp.zeros_like(lat_acc)

    # (x@W + b) - (t@W + b) == (x - t) @ W : the bias cancels, only the diff matters.
    d = x_ref[...].astype(jnp.float32) - t_ref[...].astype(jnp.float32)  # (Bt, C, T)

    # Latent-MSE partial sums (exact f32 on the VPU, lane reduce on the XLU).
    lat_acc[...] += jnp.sum(d * d, axis=-1)                              # (Bt, C)

    # Per-row Gram matrix: long HW axis on the MXU contraction (its sweet spot).
    g_acc[...] += jnp.einsum("bct,bdt->bcd", d, d,
                             preferred_element_type=jnp.float32)         # (Bt, C, C)

    @pl.when(k == pl.num_programs(1) - 1)
    def _():
        wwt = wwt_ref[...]
        for i in range(bt):  # static unroll, Bt is small
            lat_i = jnp.sum(lat_acc[pl.ds(i, 1), :]) * lat_scale
            mel_i = jnp.sum(g_acc[i] * wwt)   # == MEL_WEIGHT * mean((d_i @ W)^2)
            out_ref[bb * bt + i] = lat_i + mel_i


def _pick_tiles(B, C, HW, itemsize):
    """Pick (batch_block, hw_tile).  Budget per pipelined input buffer keeps
    2 inputs x 2 double-buffers comfortably within v7x's 64 MiB VMEM."""
    budget = 8 * 1024 * 1024  # bytes per input tile

    hw_tile = HW
    if HW % 128 == 0:
        cands = [t for t in range(128, HW + 1, 128)
                 if HW % t == 0 and t * C * itemsize <= budget]
        if cands:
            hw_tile = cands[-1]
    # else: full-HW block (allowed since it equals the full array dim)

    bt = 1
    per_row = hw_tile * C * itemsize
    for cand in range(B, 0, -1):
        if B % cand == 0 and cand * per_row <= budget:
            bt = cand
            break
    return bt, hw_tile


def mel_loss(input_lat, target_lat, dec_w, dec_b, gt_wav=None, gt_text=None,
             reduction="instance"):
    """input_lat/target_lat: NCHW [B, C_lat, H, W] (PyTorch convention).
    gt_wav / gt_text are accepted for signature parity but unused (as in the module)."""
    B, C, H, W = input_lat.shape
    C_mel = dec_w.shape[1]
    HW = H * W

    # NCHW -> [B, C_lat, H*W]: a free reshape (no data movement); H*W is lane-dense.
    x = input_lat.reshape(B, C, HW)
    t = target_lat.reshape(B, C, HW)

    # Decoded-mel MSE depends only on d = x - t (bias cancels):
    #   MEL_WEIGHT * mean((d @ W)^2) = sum(G * [MEL_WEIGHT/(C_mel*HW) * W W^T]),
    # with G = d d^T the C x C Gram matrix.  Precompute the tiny scaled W W^T here;
    # dec_b is mathematically irrelevant to the loss value.
    w = dec_w.astype(jnp.float32)
    wwt_scaled = (MEL_WEIGHT / (C_mel * HW)) * (w @ w.T)              # (C, C)
    lat_scale = MSE_WEIGHT / (C * HW)

    bt, hw_tile = _pick_tiles(B, C, HW, x.dtype.itemsize)
    grid = (B // bt, HW // hw_tile)   # reduction (HW) axis last

    kernel = functools.partial(_mel_loss_kernel, bt=bt, lat_scale=float(lat_scale))

    inst = pl.pallas_call(
        kernel,
        out_shape=jax.ShapeDtypeStruct((B,), jnp.float32),
        grid_spec=pltpu.PrefetchScalarGridSpec(
            num_scalar_prefetch=0,
            grid=grid,
            in_specs=[
                pl.BlockSpec((bt, C, hw_tile), lambda b, k: (b, 0, k)),  # input latent
                pl.BlockSpec((bt, C, hw_tile), lambda b, k: (b, 0, k)),  # target latent
                pl.BlockSpec((C, C), lambda b, k: (0, 0)),               # scaled W W^T
            ],
            # Per-instance scalars: whole (B,) output resident in SMEM.
            out_specs=pl.BlockSpec(memory_space=pltpu.SMEM),
            scratch_shapes=[
                pltpu.VMEM((bt, C, C), jnp.float32),   # Gram accumulator
                pltpu.VMEM((bt, C), jnp.float32),      # latent-MSE accumulator
            ],
        ),
        # TODO(synk): on v7x the batch-block axis could be marked "parallel" to shard
        # across both TensorCores, but that requires a blocked (per-b) output first;
        # keeping "arbitrary" is safe on all generations with the shared SMEM output.
        compiler_params=pltpu.CompilerParams(
            dimension_semantics=("arbitrary", "arbitrary"),
            vmem_limit_bytes=48 * 1024 * 1024,
        ),
    )(x, t, wwt_scaled)

    if reduction == "instance":
        return inst
    elif reduction == "mean":
        return inst.mean()
    elif reduction == "sum":
        return inst.sum()
    else:
        raise ValueError("Unknown loss reduction option.")


def _reference(input_lat, target_lat, dec_w, dec_b):
    """Pure-JAX reference mirroring the PyTorch forward (explicit decode + two MSEs)."""
    B, C, H, W = input_lat.shape
    x = jnp.transpose(input_lat.astype(jnp.float32), (0, 2, 3, 1)).reshape(B, H * W, C)
    t = jnp.transpose(target_lat.astype(jnp.float32), (0, 2, 3, 1)).reshape(B, H * W, C)
    w = dec_w.astype(jnp.float32)
    x_mel = jnp.einsum("bnc,cm->bnm", x, w,
                       precision=jax.lax.Precision.HIGHEST) + dec_b[None, None, :]
    t_mel = jnp.einsum("bnc,cm->bnm", t, w,
                       precision=jax.lax.Precision.HIGHEST) + dec_b[None, None, :]
    l1 = jnp.mean((x_mel - t_mel) ** 2, axis=(1, 2)) * MEL_WEIGHT
    l2 = jnp.mean((x - t) ** 2, axis=(1, 2)) * MSE_WEIGHT
    return l1 + l2


if __name__ == "__main__":
    key = jax.random.PRNGKey(0)
    k1, k2, k3, k4, k5 = jax.random.split(key, 5)

    B, C_LAT, H, W = 2, 4, 16, 16
    C_MEL = 8

    input_lat = jax.random.normal(k1, (B, C_LAT, H, W), dtype=jnp.float32)
    target_lat = jax.random.normal(k2, (B, C_LAT, H, W), dtype=jnp.float32)
    # Unused (as in the PyTorch forward), kept for signature parity.
    gt_wav = jax.random.normal(k3, (B, 256), dtype=jnp.float32)
    gt_text = jnp.zeros((B, 8), dtype=jnp.int32)

    # Deterministic synthetic "VAE first-stage decoder" parameters (distinct keys).
    dec_w = jax.random.normal(k5, (C_LAT, C_MEL), dtype=jnp.float32) * 0.1
    dec_b = jax.random.normal(k4, (C_MEL,), dtype=jnp.float32) * 0.01

    loss = mel_loss(input_lat, target_lat, dec_w, dec_b, gt_wav, gt_text,
                    reduction="instance")
    loss = jax.block_until_ready(loss)

    ref = _reference(input_lat, target_lat, dec_w, dec_b)
    assert loss.shape == (B,)
    # Gram refactor reassociates the f32 sums (and the MXU may use bf16 passes for the
    # small mel term), so allow a slightly looser — but still tight — tolerance.
    assert jnp.allclose(loss, ref, rtol=1e-4, atol=1e-5), (loss, ref)

    print("KERNEL_OK")
</pallas_src>

<mosaic_0001>
module attributes {stable_mosaic.version = 11 : i64} {
  func.func @_mel_loss_kernel(%arg0: i32, %arg1: i32, %arg2: memref<2x4x256xf32, #tpu.memory_space<vmem>>, %arg3: memref<2x4x256xf32, #tpu.memory_space<vmem>>, %arg4: memref<4x4xf32, #tpu.memory_space<vmem>>, %arg5: memref<2xf32, #tpu.memory_space<smem>>, %arg6: memref<2x4x4xf32, #tpu.memory_space<vmem>>, %arg7: memref<2x4xf32, #tpu.memory_space<vmem>>) attributes {dimension_semantics = [#tpu.dimension_semantics<arbitrary>, #tpu.dimension_semantics<arbitrary>], iteration_bounds = array<i64: 1, 1>, scalar_prefetch = 0 : i64, scratch_operands = 2 : i64, tpu.core_type = #tpu.core_type<tc>, window_params = [{transform_indices = @transform_0, window_bounds = array<i64: 2, 4, 256>}, {transform_indices = @transform_1, window_bounds = array<i64: 2, 4, 256>}, {pipeline_mode = #tpu.pipeline_mode<synchronous>, transform_indices = @transform_2, window_bounds = array<i64: 4, 4>}, {transform_indices = @transform_3, window_bounds = array<i64: 2>}]} {
    %c0_i32 = arith.constant 0 : i32
    %0 = arith.cmpi eq, %arg1, %c0_i32 : i32
    %1 = arith.extui %0 : i1 to i32
    %c0_i32_0 = arith.constant 0 : i32
    %2 = arith.cmpi ne, %1, %c0_i32_0 : i32
    scf.if %2 {
      %cst_19 = arith.constant 0.000000e+00 : f32
      %18 = vector.broadcast %cst_19 : f32 to vector<2x4x4xf32>
      %c0_20 = arith.constant 0 : index
      %c0_21 = arith.constant 0 : index
      %c0_22 = arith.constant 0 : index
      %19 = vector.load %arg6[%c0_20, %c0_21, %c0_22] : memref<2x4x4xf32, #tpu.memory_space<vmem>>, vector<2x4x4xf32>
      tpu.vector_store %arg6[%c0_20, %c0_21, %c0_22], %18 {strides = array<i32>} : memref<2x4x4xf32, #tpu.memory_space<vmem>>, vector<2x4x4xf32>,
      %cst_23 = arith.constant 0.000000e+00 : f32
      %20 = vector.broadcast %cst_23 : f32 to vector<2x4xf32>
      %c0_24 = arith.constant 0 : index
      %c0_25 = arith.constant 0 : index
      %21 = vector.load %arg7[%c0_24, %c0_25] : memref<2x4xf32, #tpu.memory_space<vmem>>, vector<2x4xf32>
      tpu.vector_store %arg7[%c0_24, %c0_25], %20 {strides = array<i32>} : memref<2x4xf32, #tpu.memory_space<vmem>>, vector<2x4xf32>,
    } else {
    }
    %c0 = arith.constant 0 : index
    %c0_1 = arith.constant 0 : index
    %c0_2 = arith.constant 0 : index
    %3 = vector.load %arg2[%c0, %c0_1, %c0_2] : memref<2x4x256xf32, #tpu.memory_space<vmem>>, vector<2x4x256xf32>
    %c0_3 = arith.constant 0 : index
    %c0_4 = arith.constant 0 : index
    %c0_5 = arith.constant 0 : index
    %4 = vector.load %arg3[%c0_3, %c0_4, %c0_5] : memref<2x4x256xf32, #tpu.memory_space<vmem>>, vector<2x4x256xf32>
    %5 = arith.subf %3, %4 : vector<2x4x256xf32>
    %c0_6 = arith.constant 0 : index
    %c0_7 = arith.constant 0 : index
    %6 = vector.load %arg7[%c0_6, %c0_7] : memref<2x4xf32, #tpu.memory_space<vmem>>, vector<2x4xf32>
    %7 = arith.mulf %5, %5 : vector<2x4x256xf32>
    %cst = arith.constant dense<0.000000e+00> : vector<2x4xf32>
    %8 = vector.multi_reduction <add>, %7, %cst [2] : vector<2x4x256xf32> to vector<2x4xf32>
    %9 = arith.addf %6, %8 : vector<2x4xf32>
    %c0_8 = arith.constant 0 : index
    %c0_9 = arith.constant 0 : index
    %10 = vector.load %arg7[%c0_8, %c0_9] : memref<2x4xf32, #tpu.memory_space<vmem>>, vector<2x4xf32>
    tpu.vector_store %arg7[%c0_8, %c0_9], %9 {strides = array<i32>} : memref<2x4xf32, #tpu.memory_space<vmem>>, vector<2x4xf32>,
    %c0_10 = arith.constant 0 : index
    %c0_11 = arith.constant 0 : index
    %c0_12 = arith.constant 0 : index
    %11 = vector.load %arg6[%c0_10, %c0_11, %c0_12] : memref<2x4x4xf32, #tpu.memory_space<vmem>>, vector<2x4x4xf32>
    "tpu.trace_start"() <{level = 10 : i32, message = "bct,bdt->bcd"}> : () -> ()
    %cst_13 = arith.constant dense<0.000000e+00> : vector<2x4x4xf32>
    %12 = tpu.matmul %5, %5, %cst_13 {dimension_numbers = #tpu.dot_dimension_numbers<[2], [2], [1], [1], [0, 0, 0, 1, 1, 1], [0], [0]>} : vector<2x4x256xf32>, vector<2x4x256xf32>, vector<2x4x4xf32> -> vector<2x4x4xf32>
    "tpu.trace_stop"() : () -> ()
    %13 = arith.addf %11, %12 : vector<2x4x4xf32>
    %c0_14 = arith.constant 0 : index
    %c0_15 = arith.constant 0 : index
    %c0_16 = arith.constant 0 : index
    %14 = vector.load %arg6[%c0_14, %c0_15, %c0_16] : memref<2x4x4xf32, #tpu.memory_space<vmem>>, vector<2x4x4xf32>
    tpu.vector_store %arg6[%c0_14, %c0_15, %c0_16], %13 {strides = array<i32>} : memref<2x4x4xf32, #tpu.memory_space<vmem>>, vector<2x4x4xf32>,
    %c0_i32_17 = arith.constant 0 : i32
    %15 = arith.cmpi eq, %arg1, %c0_i32_17 : i32
    %16 = arith.extui %15 : i1 to i32
    %c0_i32_18 = arith.constant 0 : i32
    %17 = arith.cmpi ne, %16, %c0_i32_18 : i32
    scf.if %17 {
      %c0_19 = arith.constant 0 : index
      %c0_20 = arith.constant 0 : index
      %18 = vector.load %arg4[%c0_19, %c0_20] : memref<4x4xf32, #tpu.memory_space<vmem>>, vector<4x4xf32>
      %c0_21 = arith.constant 0 : index
      %c0_22 = arith.constant 0 : index
      %19 = vector.load %arg7[%c0_21, %c0_22] : memref<2x4xf32, #tpu.memory_space<vmem>>, vector<1x4xf32>
      %20 = vector.shape_cast %19 : vector<1x4xf32> to vector<1x1x4xf32>
      %cst_23 = arith.constant dense<0.000000e+00> : vector<1xf32>
      %21 = vector.multi_reduction <add>, %20, %cst_23 [1, 2] : vector<1x1x4xf32> to vector<1xf32>
      %22 = vector.shape_cast %21 : vector<1xf32> to vector<1x1x1xf32>
      %23 = vector.extract %22[0, 0, 0] : f32 from vector<1x1x1xf32>
      %cst_24 = arith.constant 6.83593738E-4 : f32
      %24 = arith.mulf %23, %cst_24 : f32
      %c0_25 = arith.constant 0 : index
      %c0_26 = arith.constant 0 : index
      %c0_27 = arith.constant 0 : index
      %25 = vector.load %arg6[%c0_25, %c0_26, %c0_27] : memref<2x4x4xf32, #tpu.memory_space<vmem>>, vector<1x4x4xf32>
      %26 = vector.shape_cast %25 : vector<1x4x4xf32> to vector<4x4xf32>
      %27 = arith.mulf %26, %18 : vector<4x4xf32>
      %28 = vector.shape_cast %27 : vector<4x4xf32> to vector<1x4x4xf32>
      %cst_28 = arith.constant dense<0.000000e+00> : vector<1xf32>
      %29 = vector.multi_reduction <add>, %28, %cst_28 [1, 2] : vector<1x4x4xf32> to vector<1xf32>
      %30 = vector.shape_cast %29 : vector<1xf32> to vector<1x1x1xf32>
      %31 = vector.extract %30[0, 0, 0] : f32 from vector<1x1x1xf32>
      %32 = arith.addf %24, %31 : f32
      %c2_i32 = arith.constant 2 : i32
      %33 = arith.muli %arg0, %c2_i32 : i32
      %c0_i32_29 = arith.constant 0 : i32
      %34 = arith.addi %33, %c0_i32_29 : i32
      %35 = arith.index_cast %34 : i32 to index
      %36 = memref.load %arg5[%35] : memref<2xf32, #tpu.memory_space<smem>>
      memref.store %32, %arg5[%35] : memref<2xf32, #tpu.memory_space<smem>>
      %c1 = arith.constant 1 : index
      %c0_30 = arith.constant 0 : index
      %37 = vector.load %arg7[%c1, %c0_30] : memref<2x4xf32, #tpu.memory_space<vmem>>, vector<1x4xf32>
      %38 = vector.shape_cast %37 : vector<1x4xf32> to vector<1x1x4xf32>
      %cst_31 = arith.constant dense<0.000000e+00> : vector<1xf32>
      %39 = vector.multi_reduction <add>, %38, %cst_31 [1, 2] : vector<1x1x4xf32> to vector<1xf32>
      %40 = vector.shape_cast %39 : vector<1xf32> to vector<1x1x1xf32>
      %41 = vector.extract %40[0, 0, 0] : f32 from vector<1x1x1xf32>
      %cst_32 = arith.constant 6.83593738E-4 : f32
      %42 = arith.mulf %41, %cst_32 : f32
      %c1_33 = arith.constant 1 : index
      %c0_34 = arith.constant 0 : index
      %c0_35 = arith.constant 0 : index
      %43 = vector.load %arg6[%c1_33, %c0_34, %c0_35] : memref<2x4x4xf32, #tpu.memory_space<vmem>>, vector<1x4x4xf32>
      %44 = vector.shape_cast %43 : vector<1x4x4xf32> to vector<4x4xf32>
      %45 = arith.mulf %44, %18 : vector<4x4xf32>
      %46 = vector.shape_cast %45 : vector<4x4xf32> to vector<1x4x4xf32>
      %cst_36 = arith.constant dense<0.000000e+00> : vector<1xf32>
      %47 = vector.multi_reduction <add>, %46, %cst_36 [1, 2] : vector<1x4x4xf32> to vector<1xf32>
      %48 = vector.shape_cast %47 : vector<1xf32> to vector<1x1x1xf32>
      %49 = vector.extract %48[0, 0, 0] : f32 from vector<1x1x1xf32>
      %50 = arith.addf %42, %49 : f32
      %c2_i32_37 = arith.constant 2 : i32
      %51 = arith.muli %arg0, %c2_i32_37 : i32
      %c1_i32 = arith.constant 1 : i32
      %52 = arith.addi %51, %c1_i32 : i32
      %53 = arith.index_cast %52 : i32 to index
      %54 = memref.load %arg5[%53] : memref<2xf32, #tpu.memory_space<smem>>
      memref.store %50, %arg5[%53] : memref<2xf32, #tpu.memory_space<smem>>
    } else {
    }
    return
  }
  func.func @transform_0(%arg0: i32, %arg1: i32) -> (i32, i32, i32) {
    %c0_i32 = arith.constant 0 : i32
    %c0_i32_0 = arith.constant 0 : i32
    return %arg0, %c0_i32, %arg1 : i32, i32, i32
  }
  func.func @transform_1(%arg0: i32, %arg1: i32) -> (i32, i32, i32) {
    %c0_i32 = arith.constant 0 : i32
    %c0_i32_0 = arith.constant 0 : i32
    return %arg0, %c0_i32, %arg1 : i32, i32, i32
  }
  func.func @transform_2(%arg0: i32, %arg1: i32) -> (i32, i32) {
    %c0_i32 = arith.constant 0 : i32
    %c0_i32_0 = arith.constant 0 : i32
    %c0_i32_1 = arith.constant 0 : i32
    return %c0_i32, %c0_i32_0 : i32, i32
  }
  func.func @transform_3(%arg0: i32, %arg1: i32) -> i32 {
    %c0_i32 = arith.constant 0 : i32
    %c0_i32_0 = arith.constant 0 : i32
    return %c0_i32 : i32
  }
}

</mosaic_0001>

<bundles_post_ra>
// kernel: tpu_custom_call.1
= control target key start
LH: loop header
LB: loop body
LE: loop exit
PB: predicated region body
PF: predicated region fallthrough
CT: control target
= control target key end

     0   :  { %8 = vsyncpa [#allocation5], 0  ;;  %s478_s0 = inlined_call_operand.hbm [shape: f32[2,4,256], index: 0, kind: input, shape index: {}]   ;;  %s479_s1 = inlined_call_operand.hbm [shape: f32[2,4,256], index: 1, kind: input, shape index: {}]   ;;  %s480_s2 = inlined_call_operand.hbm [shape: f32[4,4], index: 2, kind: input, shape index: {}]   ;;  %s481_s3 = inlined_call_operand.hbm [shape: f32[2], index: 3, kind: output, shape index: {}]  }
   0x1   :  { %9 = vsyncpa [#allocation8], 0 }
   0x2   :  { %10 = vsyncpa [#allocation6], 0  ;;  %s427_s12 = smov [#allocation7]   ;;  %s428_s14 = smov [#allocation4]  }
   0x3   :  { %s28_s13 = sshll.u32 %s427_s12, 4  ;;  %s16_s15 = sshll.u32 %s428_s14, 4  ;;  %s29_s13 = int_to_ptr.vmem [resolvable:$true] %s28_s13  ;;  %s17_s15 = int_to_ptr.vmem [resolvable:$true] %s16_s15 }
   0x4   :  { %s361_s16 = scalar_lea.vmem %s29_s13, 256  ;;  %p366_p1 = scmp.lt.s32.totalorder %s29_s13, %s29_s13 }
   0x5   :  { %p362_p0 = scmp.ne.s32.totalorder %s29_s13, %s361_s16  ;;  %p367_p2 = scmp.lt.s32.totalorder %s361_s16, %s361_s16 }
   0x7   :  { %p368_p3 = por %p367_p2, %p366_p1 }
   0x9   :  { %p369_p4 = pnand %p368_p3, %p362_p0 }
   0xb   :  { %372 = shalt.err (!%p369_p4)
}
   0xc   :  { %s429_s17 = smov 128   ;;  %s430_s18 = smov 8  }
   0xd   :  { %34 = dma.hbm_to_vmem [thread:$0]  %s479_s1, 256, %s29_s13, [#allocation8], %s429_s17, %s429_s17, %s430_s18  }
   0xe   :  { %s381_s21 = scalar_lea.vmem %s17_s15, 256  ;;  %p386_p6 = scmp.lt.s32.totalorder %s17_s15, %s17_s15 }
   0xf   :  { %p382_p5 = scmp.ne.s32.totalorder %s17_s15, %s381_s21  ;;  %p387_p7 = scmp.lt.s32.totalorder %s381_s21, %s381_s21 }
  0x11   :  { %p388_p8 = por %p387_p7, %p386_p6 }
  0x13   :  { %p389_p9 = pnand %p388_p8, %p382_p5 }
  0x15   :  { %392 = shalt.err (!%p389_p9)
}
  0x16   :  { %22 = dma.hbm_to_vmem [thread:$0]  %s478_s0, 256, %s17_s15, [#allocation5], %s429_s17, %s429_s17, %s430_s18  }
  0x17   :  { %s431_s24 = smov [#allocation9]  }
  0x18   :  { %s41_s25 = sshll.u32 %s431_s24, 4  ;;  %s42_s25 = int_to_ptr.vmem [resolvable:$true] %s41_s25 }
  0x19   :  { %s401_s26 = scalar_lea.vmem %s42_s25, 64  ;;  %p406_p11 = scmp.lt.s32.totalorder %s42_s25, %s42_s25 }
  0x1a   :  { %p402_p10 = scmp.ne.s32.totalorder %s42_s25, %s401_s26  ;;  %p407_p12 = scmp.lt.s32.totalorder %s401_s26, %s401_s26 }
  0x1c   :  { %p408_p13 = por %p407_p12, %p406_p11 }
  0x1e   :  { %p409_p0 = pnand %p408_p13, %p402_p10 }
  0x20   :  { %412 = shalt.err (!%p409_p0)
}
  0x21   :  { %44 = dma.hbm_to_vmem [thread:$0]  %s480_s2, 64, %s42_s25, [#allocation8]  }
  0x22   :  { %421 = dma.done.wait [#allocation5], 256  }
  0x23   :  { %422 = vsyncadd [#allocation5], 4294967040 }
  0x24   :  { %423 = dma.done.wait [#allocation8], 320  }
  0x25   :  { %424 = vsyncadd [#allocation8], 4294966976  ;;  %v63_v0 = vld [vmem:[#allocation4] sm:$0xff]  ;;  %v65_v1 = vld [vmem:[#allocation7] sm:$0xff]  ;;  %vm78_vm0 = vcmask 1043456   ;;  %vm61_vm1 = vcmask 25600   ;;  %v91_v19 = vlaneseq }
  0x26   :  { %v64_v2 = vld [vmem:[#allocation4 + $0x8] sm:$0xff]  ;;  %v67_v3 = vsub.f32 %v63_v0, %v65_v1  ;;  %v66_v4 = vld [vmem:[#allocation7 + $0x8] sm:$0xff]  ;;  %v432_v18 = vmov 0.0   ;;  %vm58_vm2 = vcmask 27648   ;;  %vm101_vm3 = vcmask 1041409   ;;  %s433_s7 = smov [#allocation10]  }
  0x27   :  { %v68_v5 = vsub.f32 %v64_v2, %v66_v4  ;;  %62 = vst.msk [vmem:[#allocation3] sm:$0x3] %vm61_vm1, %v432_v18  ;;  %v92_v20 = vand.u32 127, %v91_v19  ;;  %v94_v21 = vshrl.u32 %v91_v19, 7  ;;  %vm265_vm4 = vcmask 24576  }
  0x28   :  { %v110_v6 = vcombine.high %v67_v3, %v67_v3  ;;  %v70_v7 = vmul.f32 %v67_v3, %v67_v3  ;;  %59 = vst.msk [vmem:[#allocation2] sm:$0xf] %vm58_vm2, %v432_v18  ;;  %60 = vst.msk [vmem:[#allocation2 + $0x4] sm:$0xf] %vm58_vm2, %v432_v18  ;;  %v263_v42 = vld [vmem:[#allocation9] sm:$0xf] }
  0x29   :  { %v183_v8 = vcombine.high %v68_v5, %v68_v5  ;;  %v71_v9 = vmul.f32 %v68_v5, %v68_v5  ;;  %v95_v22 = vsub.s32 %v92_v20, %v94_v21 }
  0x2a   :  { %142 = vmatprep.subr.mxu0 %v110_v6  ;;  %176 = vmatprep.mubr.f32.mxu0 %v110_v6  ;;  %v74_v10 = vcombine.high %v70_v7, %v70_v7  ;;  %v79_v11 = vsel %vm78_vm0, %v70_v7, 0.0 }
  0x2b   :  { %143 = vmatpush1.xpose.msra.mxu0 %v67_v3  ;;  %215 = vmatprep.subr.mxu1 %v183_v8  ;;  %v75_v12 = vcombine.high %v71_v9, %v71_v9  ;;  %v84_v14 = vsel %vm78_vm0, %v71_v9, 0.0 }
  0x2c   :  { %216 = vmatpush1.xpose.msra.mxu1 %v68_v5  ;;  %249 = vmatprep.mubr.f32.mxu1 %v183_v8  ;;  %v80_v13 = vsel %vm78_vm0, %v74_v10, 0.0 }
  0x2d   :  { %v81_v15 = vadd.f32 %v80_v13, %v79_v11  ;;  %v85_v16 = vsel %vm78_vm0, %v75_v12, 0.0 }
  0x2e   :  { %177 = vmatmul.mubr.f32.vlgmr.msra.gmra.mxu0 %v67_v3  ;;  %v86_v17 = vadd.f32 %v85_v16, %v84_v14  ;;  %v69_v26 = vld [vmem:[#allocation3] sm:$0x3] }
  0x2f   :  { %250 = vmatmul.mubr.f32.vlgmr.msra.gmra.mxu1 %v68_v5  ;;  %82 = vadd.xlane.f32.xlu0 %v81_v15  ;;  %v107_v34 = vld [vmem:[#allocation2] sm:$0xf]  ;;  %v108_v35 = vld [vmem:[#allocation2 + $0x4] sm:$0xf] }
  0x33   :  { %87 = vadd.xlane.f32.xlu0 %v86_v17 }
  0xb8   :  { %v83_v23 = vpop.xlane.xlu0 %82 }
  0xb9   :  { %v96_v24 = vrot.slane %v83_v23, %v95_v22 }
  0xbc   :  { %v88_v25 = vpop.xlane.xlu0 %87 }
  0xbd   :  { %v100_v27 = vrot.slane %v88_v25, %v95_v22 }
  0xbf   :  { %v102_v28 = vsel %vm101_vm3, %v100_v27, %v96_v24 }
  0xc0   :  { %v104_v29 = vadd.f32 %v102_v28, %v69_v26 }
  0xc2   :  { %106 = vst.msk [vmem:[#allocation3] sm:$0x3] %vm61_vm1, %v104_v29 }
  0xc9   :  { %v293_v30 = vld [vmem:[#allocation3 + $0x1] sm:$0x1]  ;;  %v264_v31 = vld [vmem:[#allocation3] sm:$0x1] }
  0xca   :  { %v294_v32 = vsel %vm265_vm4, %v293_v30, 0.0  ;;  %v266_v33 = vsel %vm265_vm4, %v264_v31, 0.0 }
  0xcb   :  { %295 = vadd.xlane.f32.xlu0 %v294_v32  ;;  %267 = vadd.xlane.f32.xlu1 %v266_v33 }
  0xee   :  { %v178_v36 = vpop.f32.mrf.mxu0 }
  0xef   :  { %v255_v37 = vadd.f32 %v178_v36, %v107_v34  ;;  %v251_v38 = vpop.f32.mrf.mxu1 }
  0xf0   :  { %v180_v39 = vpop.f32.mrf.mxu0  ;;  %v256_v40 = vadd.f32 %v251_v38, %v108_v35 }
  0xf1   :  { %258 = vst.msk [vmem:[#allocation2] sm:$0xf] %vm58_vm2, %v255_v37  ;;  %v253_v41 = vpop.f32.mrf.mxu1 }
  0xf2   :  { %259 = vst.msk [vmem:[#allocation2 + $0x4] sm:$0xf] %vm58_vm2, %v256_v40 }
  0xf8   :  { %v277_v43 = vld [vmem:[#allocation2] sm:$0xf] }
  0xf9   :  { %v278_v44 = vmul.f32 %v277_v43, %v263_v42  ;;  %v306_v45 = vld [vmem:[#allocation2 + $0x4] sm:$0xf] }
  0xfa   :  { %v307_v46 = vmul.f32 %v306_v45, %v263_v42 }
  0xfb   :  { %v279_v47 = vsel %vm58_vm2, %v278_v44, 0.0 }
  0xfc   :  { %280 = vadd.xlane.f32.xlu1 %v279_v47  ;;  %v308_v48 = vsel %vm58_vm2, %v307_v46, 0.0 }
 0x100   :  { %309 = vadd.xlane.f32.xlu1 %v308_v48 }
 0x154   :  { %v268_v49 = vpop.xlane.xlu1 %267  ;;  %v296_v56 = vpop.xlane.xlu0 %295 }
 0x155   :  { %v269_v50 = vrot.slane %v268_v49, 4  ;;  %v297_v57 = vrot.slane %v296_v56, 4 }
 0x157   :  { %v270_v51 = vadd.f32 %v269_v50, %v268_v49  ;;  %v298_v58 = vadd.f32 %v297_v57, %v296_v56 }
 0x159   :  { %v271_v52 = vrot.slane %v270_v51, 2  ;;  %v299_v59 = vrot.slane %v298_v58, 2 }
 0x15b   :  { %v272_v53 = vadd.f32 %v271_v52, %v270_v51  ;;  %v300_v63 = vadd.f32 %v299_v59, %v298_v58 }
 0x15d   :  { %v273_v54 = vrot.slane %v272_v53, 1  ;;  %v301_v5 = vrot.slane %v300_v63, 1 }
 0x15f   :  { %v274_v55 = vadd.f32 %v273_v54, %v272_v53  ;;  %v302_v10 = vadd.f32 %v301_v5, %v300_v63 }
 0x161   :  { %338 = vpush %v274_v55 }
 0x185   :  { %v281_v60 = vpop.xlane.xlu1 %280 }
 0x186   :  { %v282_v61 = vrot.slane %v281_v60, 4 }
 0x188   :  { %v283_v62 = vadd.f32 %v282_v61, %v281_v60 }
 0x189   :  { %v310_v0 = vpop.xlane.xlu1 %309 }
 0x18a   :  { %v284_v1 = vrot.slane %v283_v62, 2  ;;  %v311_v2 = vrot.slane %v310_v0, 4 }
 0x18c   :  { %v312_v3 = vadd.f32 %v311_v2, %v310_v0  ;;  %v285_v4 = vadd.f32 %v284_v1, %v283_v62 }
 0x18e   :  { %v313_v6 = vrot.slane %v312_v3, 2  ;;  %v286_v7 = vrot.slane %v285_v4, 1 }
 0x190   :  { %v314_v8 = vadd.f32 %v313_v6, %v312_v3  ;;  %v287_v9 = vadd.f32 %v286_v7, %v285_v4 }
 0x192   :  { %340 = vpush %v287_v9  ;;  %v315_v11 = vrot.slane %v314_v8, 1  ;;  %s339_s0 = spop %338 }
 0x193   :  { %342 = vpush %v302_v10  ;;  %s276_s2 = smul.f32 0.00068359374, %s339_s0 }
 0x194   :  { %v316_v12 = vadd.f32 %v315_v11, %v314_v8 }
 0x196   :  { %344 = vpush %v316_v12 }
 0x1c3   :  { %s341_s28 = spop %340 }
 0x1c4   :  { %s289_s29 = sadd.f32 %s341_s28, %s276_s2  ;;  %s343_s30 = spop %342 }
 0x1c5   :  { %s304_s4 = smul.f32 0.00068359374, %s343_s30 }
 0x1c6   :  { %292 = sst [smem:[#allocation10]] %s289_s29 }
 0x1c7   :  { %s345_s5 = spop %344 }
 0x1c8   :  { %s318_s6 = sadd.f32 %s345_s5, %s304_s4 }
 0x1ca   :  { %321 = sst [smem:[#allocation10 + $0x1]] %s318_s6 }
 0x1cb   :  { %329 = dma.smem_to_hbm %s433_s7, 16, %s481_s3, [#allocation6]  }
 0x1cc   :  { %425 = dma.done.wait [#allocation6], 16  }
 0x1cd   :  { %426 = vsyncadd [#allocation6], 4294967280 }
 0x1ce   :  { %333 = sfence }
 0x1cf   :  { %334 = vsyncpa [#allocation5], 1 }
 0x1d0   :  { %335 = vsyncpa [#allocation8], 1 }
 0x1d1   :  { %336 = vsyncpa [#allocation6], 1 }

</bundles_post_ra>
